<compile_context>
chip_gen: v7x
topology: tpu7x:2x2x1
jax: 0.10.0
libtpu: 0.0.40
codegen_flags: <defaults>
</compile_context>

<pallas_src>
import jax
import jax.numpy as jnp
from jax.experimental import pallas as pl
from jax.experimental.pallas import tpu as pltpu

_BN_EPS = 1e-5


# ---------------------------------------------------------------------------
# Kernels
# ---------------------------------------------------------------------------
def _fused_pool_linear_bn_kernel(feat_ref, wT_ref, b_ref, gamma_ref, beta_ref,
                                 out_ref):
    # feat_ref : (B, HW, C)  native dtype (bf16/f32), C lane-dense
    # wT_ref   : (C, E_pad)  f32 (pre-transposed nn.Linear weight, padded)
    # b_ref    : (1, E_pad)  f32
    # gamma/beta: (1, E_pad) f32
    # out_ref  : (B, E_pad)  f32
    feat = feat_ref[...].astype(jnp.float32)           # accumulate pool in f32
    pooled = jnp.mean(feat, axis=1)                    # sublane reduce -> (B, C)
    lin = jnp.dot(pooled, wT_ref[...],
                  preferred_element_type=jnp.float32) + b_ref[...]
    mean = jnp.mean(lin, axis=0, keepdims=True)        # train-mode batch stats
    var = jnp.mean((lin - mean) ** 2, axis=0, keepdims=True)
    xhat = (lin - mean) * jax.lax.rsqrt(var + _BN_EPS)
    out_ref[...] = (xhat * gamma_ref[...] + beta_ref[...]).astype(out_ref.dtype)


def _pool_linear_kernel(feat_ref, wT_ref, b_ref, out_ref):
    # Per-batch-tile: global average pool + Linear (pre-BN output).
    feat = feat_ref[...].astype(jnp.float32)           # (TB, HW, C)
    pooled = jnp.mean(feat, axis=1)                    # (TB, C)
    out_ref[...] = (
        jnp.dot(pooled, wT_ref[...], preferred_element_type=jnp.float32)
        + b_ref[...]
    ).astype(out_ref.dtype)


def _batchnorm1d_kernel(lin_ref, gamma_ref, beta_ref, out_ref):
    # Train-mode BatchNorm1d over the FULL batch (biased variance).
    lin = lin_ref[...].astype(jnp.float32)             # (B, E_pad)
    mean = jnp.mean(lin, axis=0, keepdims=True)
    var = jnp.mean((lin - mean) ** 2, axis=0, keepdims=True)
    xhat = (lin - mean) * jax.lax.rsqrt(var + _BN_EPS)
    out_ref[...] = (xhat * gamma_ref[...] + beta_ref[...]).astype(out_ref.dtype)


# ---------------------------------------------------------------------------
# Wrapper helpers
# ---------------------------------------------------------------------------
def _vmem_capacity_bytes():
    try:
        return int(pltpu.get_tpu_info().vmem_capacity_bytes)
    except Exception:
        return 64 * 1024 * 1024  # conservative fallback (v7x-sized)


def _pick_batch_tile(B, HW, C, itemsize, vmem_cap):
    """Size the batch tile so double-buffered feature DMAs use ~1/4 of VMEM."""
    hw_pad = ((HW + 7) // 8) * 8
    c_pad = max(((C + 127) // 128) * 128, 128)
    per_image = hw_pad * c_pad * itemsize
    budget = vmem_cap // 4
    tb = max(1, budget // (2 * per_image))
    tb = int(min(tb, B, 128))
    if tb >= 8:
        tb = (tb // 8) * 8   # keep the (TB, E_pad) output tile sublane-aligned
    return tb


def prepare_encoder_params(lin_w, lin_b, bn_gamma, bn_beta):
    """One-time param prep: transpose the Linear weight, pad E to 128 lanes."""
    E, C = lin_w.shape
    e_pad = ((E + 127) // 128) * 128
    wT = jnp.zeros((C, e_pad), jnp.float32).at[:, :E].set(
        jnp.asarray(lin_w, jnp.float32).T)
    b = jnp.zeros((1, e_pad), jnp.float32).at[:, :E].set(
        jnp.asarray(lin_b, jnp.float32))
    gamma = jnp.zeros((1, e_pad), jnp.float32).at[:, :E].set(
        jnp.asarray(bn_gamma, jnp.float32))
    beta = jnp.zeros((1, e_pad), jnp.float32).at[:, :E].set(
        jnp.asarray(bn_beta, jnp.float32))
    return wT, b, gamma, beta


def encoder_cnn_forward(features_nhwc, wT, b, gamma, beta, *,
                        embed_size, batch_tile=None):
    """features_nhwc: [B, H, W, C] backbone feature map (native dtype).
    wT/b/gamma/beta: outputs of prepare_encoder_params."""
    B, H, W, C = features_nhwc.shape
    HW = H * W
    E_pad = wT.shape[1]

    # Pure glue: flatten spatial dims. No transpose, no dtype change (C stays
    # on the lane axis, features stay in the backbone's dtype).
    feat = features_nhwc.reshape(B, HW, C)

    vmem_cap = _vmem_capacity_bytes()
    if batch_tile is None:
        batch_tile = _pick_batch_tile(B, HW, C, feat.dtype.itemsize, vmem_cap)
    tb = max(1, min(int(batch_tile), B))

    cost = pl.CostEstimate(
        flops=2 * B * C * E_pad + B * HW * C,
        transcendentals=0,
        bytes_accessed=int(feat.size * feat.dtype.itemsize
                           + wT.size * wT.dtype.itemsize
                           + B * E_pad * 4),
    )
    cparams = pltpu.CompilerParams(
        dimension_semantics=("parallel",),
        vmem_limit_bytes=int(min(vmem_cap // 2, 96 * 1024 * 1024)),
    )

    if tb >= B:
        # ---- Fast path: whole batch in one VMEM tile -> fully fused kernel.
        out = pl.pallas_call(
            _fused_pool_linear_bn_kernel,
            out_shape=jax.ShapeDtypeStruct((B, E_pad), jnp.float32),
            grid=(1,),
            in_specs=[
                pl.BlockSpec((B, HW, C), lambda i: (0, 0, 0)),
                pl.BlockSpec((C, E_pad), lambda i: (0, 0)),
                pl.BlockSpec((1, E_pad), lambda i: (0, 0)),
                pl.BlockSpec((1, E_pad), lambda i: (0, 0)),
                pl.BlockSpec((1, E_pad), lambda i: (0, 0)),
            ],
            out_specs=pl.BlockSpec((B, E_pad), lambda i: (0, 0)),
            compiler_params=cparams,
            cost_estimate=cost,
        )(feat, wT, b, gamma, beta)
        return out[:, :embed_size]

    # ---- Tiled path: kernel 1 fuses pool + Linear per batch tile.
    grid = (pl.cdiv(B, tb),)
    lin = pl.pallas_call(
        _pool_linear_kernel,
        out_shape=jax.ShapeDtypeStruct((B, E_pad), jnp.float32),
        grid=grid,
        in_specs=[
            pl.BlockSpec((tb, HW, C), lambda i: (i, 0, 0)),
            pl.BlockSpec((C, E_pad), lambda i: (0, 0)),
            pl.BlockSpec((1, E_pad), lambda i: (0, 0)),
        ],
        out_specs=pl.BlockSpec((tb, E_pad), lambda i: (i, 0)),
        compiler_params=cparams,
        cost_estimate=cost,
    )(feat, wT, b)

    # Kernel 2: BatchNorm1d over the full batch (tiny (B, E_pad) op, one block)
    # so tiling the batch in kernel 1 cannot change BN statistics.
    out = pl.pallas_call(
        _batchnorm1d_kernel,
        out_shape=jax.ShapeDtypeStruct((B, E_pad), jnp.float32),
        grid=(1,),
        in_specs=[
            pl.BlockSpec((B, E_pad), lambda i: (0, 0)),
            pl.BlockSpec((1, E_pad), lambda i: (0, 0)),
            pl.BlockSpec((1, E_pad), lambda i: (0, 0)),
        ],
        out_specs=pl.BlockSpec((B, E_pad), lambda i: (0, 0)),
    )(lin, gamma, beta)

    return out[:, :embed_size]


# ---------------------------------------------------------------------------
# Reference + test
# ---------------------------------------------------------------------------
def _reference(features_nhwc, lin_w, lin_b, bn_gamma, bn_beta):
    x = features_nhwc.astype(jnp.float32)
    pooled = jnp.mean(x, axis=(1, 2))                                   # (B, C)
    lin = pooled @ jnp.asarray(lin_w, jnp.float32).T + jnp.asarray(lin_b, jnp.float32)
    mean = jnp.mean(lin, axis=0, keepdims=True)
    var = jnp.mean((lin - mean) ** 2, axis=0, keepdims=True)
    return (lin - mean) / jnp.sqrt(var + _BN_EPS) * bn_gamma + bn_beta


if __name__ == "__main__":
    # Small deterministic stand-in shapes:
    #   B=16 images, C_feat=32 (stands in for ResNet-152's 2048),
    #   H=W=4 (stands in for the 7x7 feature map), embed_size=16.
    B, C_feat, H, W, embed_size = 16, 32, 4, 4, 16

    key = jax.random.PRNGKey(0)
    k_feat, k_w, k_b = jax.random.split(key, 3)

    # Backbone features in their native NHWC / bf16 layout (no wrapper upcast).
    features = jax.random.normal(
        k_feat, (B, H, W, C_feat), dtype=jnp.float32).astype(jnp.bfloat16)
    lin_w = jax.random.normal(k_w, (embed_size, C_feat), dtype=jnp.float32) * 0.05
    lin_b = jax.random.normal(k_b, (embed_size,), dtype=jnp.float32) * 0.05
    bn_gamma = jnp.ones((embed_size,), jnp.float32)   # torch BatchNorm1d defaults
    bn_beta = jnp.zeros((embed_size,), jnp.float32)

    wT, b2, gamma2, beta2 = prepare_encoder_params(lin_w, lin_b, bn_gamma, bn_beta)
    ref = _reference(features, lin_w, lin_b, bn_gamma, bn_beta)

    fwd = jax.jit(encoder_cnn_forward, static_argnames=("embed_size", "batch_tile"))

    # 1) Fused single-kernel path (batch fits one tile -> default sizing).
    out_fused = jax.block_until_ready(
        fwd(features, wT, b2, gamma2, beta2, embed_size=embed_size))
    assert out_fused.shape == (B, embed_size)
    assert jnp.allclose(out_fused, ref, rtol=1e-2, atol=1e-2), \
        "fused path mismatch vs JAX reference"

    # 2) Tiled path (batch_tile=8 -> 2 grid steps + separate full-batch BN).
    out_tiled = jax.block_until_ready(
        fwd(features, wT, b2, gamma2, beta2, embed_size=embed_size, batch_tile=8))
    assert out_tiled.shape == (B, embed_size)
    assert jnp.allclose(out_tiled, ref, rtol=1e-2, atol=1e-2), \
        "tiled path mismatch vs JAX reference"

    print("KERNEL_OK")
</pallas_src>

<mosaic_0001>
module attributes {stable_mosaic.version = 11 : i64} {
  func.func @_fused_pool_linear_bn_kernel(%arg0: i32, %arg1: memref<16x16x32xbf16, #tpu.memory_space<vmem>>, %arg2: memref<32x128xf32, #tpu.memory_space<vmem>>, %arg3: memref<1x128xf32, #tpu.memory_space<vmem>>, %arg4: memref<1x128xf32, #tpu.memory_space<vmem>>, %arg5: memref<1x128xf32, #tpu.memory_space<vmem>>, %arg6: memref<16x128xf32, #tpu.memory_space<vmem>>) attributes {dimension_semantics = [#tpu.dimension_semantics<parallel>], iteration_bounds = array<i64: 1>, scalar_prefetch = 0 : i64, scratch_operands = 0 : i64, tpu.core_type = #tpu.core_type<tc>, window_params = [{pipeline_mode = #tpu.pipeline_mode<synchronous>, transform_indices = @transform_0, window_bounds = array<i64: 16, 16, 32>}, {pipeline_mode = #tpu.pipeline_mode<synchronous>, transform_indices = @transform_1, window_bounds = array<i64: 32, 128>}, {pipeline_mode = #tpu.pipeline_mode<synchronous>, transform_indices = @transform_2, window_bounds = array<i64: 1, 128>}, {pipeline_mode = #tpu.pipeline_mode<synchronous>, transform_indices = @transform_3, window_bounds = array<i64: 1, 128>}, {pipeline_mode = #tpu.pipeline_mode<synchronous>, transform_indices = @transform_4, window_bounds = array<i64: 1, 128>}, {pipeline_mode = #tpu.pipeline_mode<synchronous>, transform_indices = @transform_5, window_bounds = array<i64: 16, 128>}]} {
    %c0 = arith.constant 0 : index
    %c0_0 = arith.constant 0 : index
    %c0_1 = arith.constant 0 : index
    %0 = vector.load %arg1[%c0, %c0_0, %c0_1] : memref<16x16x32xbf16, #tpu.memory_space<vmem>>, vector<16x16x32xbf16>
    %1 = arith.extf %0 : vector<16x16x32xbf16> to vector<16x16x32xf32>
    %cst = arith.constant dense<0.000000e+00> : vector<16x32xf32>
    %2 = vector.multi_reduction <add>, %1, %cst [1] : vector<16x16x32xf32> to vector<16x32xf32>
    %cst_2 = arith.constant 1.600000e+01 : f32
    %3 = vector.broadcast %cst_2 : f32 to vector<16x32xf32>
    %4 = arith.divf %2, %3 : vector<16x32xf32>
    %c0_3 = arith.constant 0 : index
    %c0_4 = arith.constant 0 : index
    %5 = vector.load %arg2[%c0_3, %c0_4] : memref<32x128xf32, #tpu.memory_space<vmem>>, vector<32x128xf32>
    %cst_5 = arith.constant dense<0.000000e+00> : vector<16x128xf32>
    %6 = tpu.matmul %4, %5, %cst_5 {dimension_numbers = #tpu.dot_dimension_numbers<[1], [0], [0], [1], [0, 0, 1, 1], [], []>} : vector<16x32xf32>, vector<32x128xf32>, vector<16x128xf32> -> vector<16x128xf32>
    %c0_6 = arith.constant 0 : index
    %c0_7 = arith.constant 0 : index
    %7 = vector.load %arg3[%c0_6, %c0_7] : memref<1x128xf32, #tpu.memory_space<vmem>>, vector<1x128xf32>
    %8 = vector.broadcast %7 : vector<1x128xf32> to vector<16x128xf32>
    %9 = arith.addf %6, %8 : vector<16x128xf32>
    %cst_8 = arith.constant dense<0.000000e+00> : vector<128xf32>
    %10 = vector.multi_reduction <add>, %9, %cst_8 [0] : vector<16x128xf32> to vector<128xf32>
    %11 = vector.shape_cast %10 : vector<128xf32> to vector<1x128xf32>
    %cst_9 = arith.constant 1.600000e+01 : f32
    %12 = vector.broadcast %cst_9 : f32 to vector<1x128xf32>
    %13 = arith.divf %11, %12 : vector<1x128xf32>
    %14 = vector.broadcast %13 : vector<1x128xf32> to vector<16x128xf32>
    %15 = arith.subf %9, %14 : vector<16x128xf32>
    %16 = arith.mulf %15, %15 : vector<16x128xf32>
    %cst_10 = arith.constant dense<0.000000e+00> : vector<128xf32>
    %17 = vector.multi_reduction <add>, %16, %cst_10 [0] : vector<16x128xf32> to vector<128xf32>
    %18 = vector.shape_cast %17 : vector<128xf32> to vector<1x128xf32>
    %cst_11 = arith.constant 1.600000e+01 : f32
    %19 = vector.broadcast %cst_11 : f32 to vector<1x128xf32>
    %20 = arith.divf %18, %19 : vector<1x128xf32>
    %21 = vector.broadcast %13 : vector<1x128xf32> to vector<16x128xf32>
    %22 = arith.subf %9, %21 : vector<16x128xf32>
    %cst_12 = arith.constant 9.99999974E-6 : f32
    %23 = vector.broadcast %cst_12 : f32 to vector<1x128xf32>
    %24 = arith.addf %20, %23 : vector<1x128xf32>
    %25 = math.rsqrt %24 : vector<1x128xf32>
    %26 = vector.broadcast %25 : vector<1x128xf32> to vector<16x128xf32>
    %27 = arith.mulf %22, %26 : vector<16x128xf32>
    %c0_13 = arith.constant 0 : index
    %c0_14 = arith.constant 0 : index
    %28 = vector.load %arg4[%c0_13, %c0_14] : memref<1x128xf32, #tpu.memory_space<vmem>>, vector<1x128xf32>
    %29 = vector.broadcast %28 : vector<1x128xf32> to vector<16x128xf32>
    %30 = arith.mulf %27, %29 : vector<16x128xf32>
    %c0_15 = arith.constant 0 : index
    %c0_16 = arith.constant 0 : index
    %31 = vector.load %arg5[%c0_15, %c0_16] : memref<1x128xf32, #tpu.memory_space<vmem>>, vector<1x128xf32>
    %32 = vector.broadcast %31 : vector<1x128xf32> to vector<16x128xf32>
    %33 = arith.addf %30, %32 : vector<16x128xf32>
    %c0_17 = arith.constant 0 : index
    %c0_18 = arith.constant 0 : index
    %34 = vector.load %arg6[%c0_17, %c0_18] : memref<16x128xf32, #tpu.memory_space<vmem>>, vector<16x128xf32>
    tpu.vector_store %arg6[%c0_17, %c0_18], %33 {strides = array<i32>} : memref<16x128xf32, #tpu.memory_space<vmem>>, vector<16x128xf32>,
    return
  }
  func.func @transform_0(%arg0: i32) -> (i32, i32, i32) {
    %c0_i32 = arith.constant 0 : i32
    %c0_i32_0 = arith.constant 0 : i32
    %c0_i32_1 = arith.constant 0 : i32
    %c0_i32_2 = arith.constant 0 : i32
    return %c0_i32, %c0_i32_0, %c0_i32_1 : i32, i32, i32
  }
  func.func @transform_1(%arg0: i32) -> (i32, i32) {
    %c0_i32 = arith.constant 0 : i32
    %c0_i32_0 = arith.constant 0 : i32
    %c0_i32_1 = arith.constant 0 : i32
    return %c0_i32, %c0_i32_0 : i32, i32
  }
  func.func @transform_2(%arg0: i32) -> (i32, i32) {
    %c0_i32 = arith.constant 0 : i32
    %c0_i32_0 = arith.constant 0 : i32
    %c0_i32_1 = arith.constant 0 : i32
    return %c0_i32, %c0_i32_0 : i32, i32
  }
  func.func @transform_3(%arg0: i32) -> (i32, i32) {
    %c0_i32 = arith.constant 0 : i32
    %c0_i32_0 = arith.constant 0 : i32
    %c0_i32_1 = arith.constant 0 : i32
    return %c0_i32, %c0_i32_0 : i32, i32
  }
  func.func @transform_4(%arg0: i32) -> (i32, i32) {
    %c0_i32 = arith.constant 0 : i32
    %c0_i32_0 = arith.constant 0 : i32
    %c0_i32_1 = arith.constant 0 : i32
    return %c0_i32, %c0_i32_0 : i32, i32
  }
  func.func @transform_5(%arg0: i32) -> (i32, i32) {
    %c0_i32 = arith.constant 0 : i32
    %c0_i32_0 = arith.constant 0 : i32
    %c0_i32_1 = arith.constant 0 : i32
    return %c0_i32, %c0_i32_0 : i32, i32
  }
}

</mosaic_0001>

<bundles_post_ra>
// kernel: encoder_cnn_forward.1
= control target key start
LH: loop header
LB: loop body
LE: loop exit
PB: predicated region body
PF: predicated region fallthrough
CT: control target
= control target key end

     0   :  { %10 = vsyncpa [#allocation3], 0  ;;  %s790_s0 = inlined_call_operand.hbm [shape: bf16[16,16,32], index: 0, kind: input, shape index: {}]   ;;  %s791_s1 = inlined_call_operand.hbm [shape: f32[32,128], index: 1, kind: input, shape index: {}]   ;;  %s792_s2 = inlined_call_operand.vmem [shape: f32[1,128], index: 2, kind: input, shape index: {}]   ;;  %s793_s3 = inlined_call_operand.vmem [shape: f32[1,128], index: 3, kind: input, shape index: {}]   ;;  %s794_s4 = inlined_call_operand.vmem [shape: f32[1,128], index: 4, kind: input, shape index: {}]   ;;  %s795_s5 = inlined_call_operand.hbm [shape: f32[16,128], index: 5, kind: output, shape index: {}]  }
   0x1   :  { %11 = vsyncpa [#allocation6], 0 }
   0x2   :  { %12 = vsyncpa [#allocation4], 0  ;;  %s654_s18 = smov [#allocation2]   ;;  %s582_s22 = scalar_lea.hbm %s790_s0, 2048 }
   0x3   :  { %s18_s19 = sshll.u32 %s654_s18, 4  ;;  %p583_p0 = scmp.ne.s32.totalorder %s790_s0, %s582_s22  ;;  %s19_s19 = int_to_ptr.vmem [resolvable:$true] %s18_s19 }
   0x4   :  { %p586_p1 = scmp.lt.u32.totalorder %s582_s22, %s790_s0 }
   0x6   :  { %p588_p2 = pnand %p586_p1, %p583_p0 }
   0x8   :  { %591 = shalt.err (!%p588_p2)
}
   0x9   :  { %s592_s27 = scalar_lea.vmem %s19_s19, 2048  ;;  %p597_p4 = scmp.lt.s32.totalorder %s19_s19, %s19_s19 }
   0xa   :  { %p593_p3 = scmp.ne.s32.totalorder %s19_s19, %s592_s27  ;;  %p598_p5 = scmp.lt.s32.totalorder %s592_s27, %s592_s27 }
   0xc   :  { %p599_p6 = por %p598_p5, %p597_p4 }
   0xe   :  { %p600_p7 = pnand %p599_p6, %p593_p3 }
  0x10   :  { %603 = shalt.err (!%p600_p7)
}
  0x11   :  { %s655_s28 = smov 64   ;;  %s656_s29 = smov 4  }
  0x12   :  { %24 = dma.hbm_to_vmem [thread:$0]  %s790_s0, 2048, %s19_s19, [#allocation3], %s655_s28, %s655_s28, %s656_s29  }
  0x13   :  { %s657_s7 = smov [#allocation5]   ;;  %s604_s11 = scalar_lea.hbm %s791_s1, 512 }
  0x14   :  { %s30_s8 = sshll.u32 %s657_s7, 4  ;;  %p605_p8 = scmp.ne.s32.totalorder %s791_s1, %s604_s11  ;;  %s31_s8 = int_to_ptr.vmem [resolvable:$true] %s30_s8 }
  0x15   :  { %p608_p9 = scmp.lt.u32.totalorder %s604_s11, %s791_s1 }
  0x17   :  { %p610_p10 = pnand %p608_p9, %p605_p8 }
  0x19   :  { %613 = shalt.err (!%p610_p10)
}
  0x1a   :  { %s614_s16 = scalar_lea.vmem %s31_s8, 512  ;;  %p619_p12 = scmp.lt.s32.totalorder %s31_s8, %s31_s8 }
  0x1b   :  { %p615_p11 = scmp.ne.s32.totalorder %s31_s8, %s614_s16  ;;  %p620_p13 = scmp.lt.s32.totalorder %s614_s16, %s614_s16 }
  0x1d   :  { %p621_p0 = por %p620_p13, %p619_p12 }
  0x1f   :  { %p622_p1 = pnand %p621_p0, %p615_p11 }
  0x21   :  { %625 = shalt.err (!%p622_p1)
}
  0x22   :  { %s658_s0 = smov 128   ;;  %s659_s17 = smov 8  }
  0x23   :  { %36 = dma.hbm_to_vmem [thread:$0]  %s791_s1, 512, %s31_s8, [#allocation6], %s658_s0, %s658_s0, %s659_s17  }
  0x24   :  { %648 = dma.done.wait [#allocation3], 2048  }
  0x25   :  { %649 = vsyncadd [#allocation3], 4294965248 }
  0x26   :  { %650 = dma.done.wait [#allocation6], 512  }
  0x27   :  { %651 = vsyncadd [#allocation6], 4294966784  ;;  %v275_v0 = vld [vmem:[#allocation5] sm:$0xff]  ;;  %v276_v1 = vld [vmem:[#allocation5 + $0x8] sm:$0xff]  ;;  %vm113_vm0 = vcmask 261120   ;;  %vm302_vm1 = vcmask 1041409  }
  0x28   :  { %v277_v2 = vld [vmem:[#allocation5 + $0x10] sm:$0xff]  ;;  %v565_v3 = vpack.c.bf16 %v276_v1, %v275_v0  ;;  %v278_v4 = vld [vmem:[#allocation5 + $0x18] sm:$0xff]  ;;  %v470_v5 = vld [vmem:[#allocation2] sm:$0xff]   ;;  %vm304_vm2 = vcmask 1042434   ;;  %vm306_vm3 = vcmask 1043459   ;;  %vm308_vm4 = vcmask 1044484  }
  0x29   :  { %v533_v6 = vld [vmem:[#allocation2 + $0x8] sm:$0xff]   ;;  %v569_v7 = vpack.c.bf16 %v278_v4, %v277_v2  ;;  %v471_v8 = vunpack.c.l.bf16 %v470_v5  ;;  %v472_v9 = vunpack.c.h.bf16 %v470_v5  ;;  %v534_v11 = vld [vmem:[#allocation2 + $0x10] sm:$0xff]   ;;  %v535_v12 = vld [vmem:[#allocation2 + $0x18] sm:$0xff]   ;;  %vm310_vm5 = vcmask 1045509   ;;  %s660_s24 = smov [#allocation7]  }
  0x2a   :  { %v475_v10 = vunpack.c.l.bf16 %v533_v6  ;;  %v536_v13 = vld [vmem:[#allocation2 + $0x20] sm:$0xff]   ;;  %566 = vmatprep.subr.bf16.mxu0 %v565_v3  ;;  %v476_v14 = vunpack.c.h.bf16 %v533_v6  ;;  %v479_v15 = vunpack.c.l.bf16 %v534_v11  ;;  %v480_v16 = vunpack.c.h.bf16 %v534_v11  ;;  %v537_v18 = vld [vmem:[#allocation2 + $0x28] sm:$0xff]   ;;  %v538_v19 = vld [vmem:[#allocation2 + $0x30] sm:$0xff]   ;;  %s451_s25 = sshll.u32 %s660_s24, 4  ;;  %s452_s25 = int_to_ptr.vmem [resolvable:$true] %s451_s25 }
  0x2b   :  { %v483_v17 = vunpack.c.l.bf16 %v535_v12  ;;  %v539_v20 = vld [vmem:[#allocation2 + $0x38] sm:$0xff]   ;;  %568 = vmatpush3.bf16.msra.mxu0 %v565_v3  ;;  %v484_v21 = vunpack.c.h.bf16 %v535_v12  ;;  %v487_v22 = vunpack.c.l.bf16 %v536_v13  ;;  %v488_v23 = vunpack.c.h.bf16 %v536_v13  ;;  %s626_s26 = scalar_lea.vmem %s452_s25, 256  ;;  %p631_p3 = scmp.lt.s32.totalorder %s452_s25, %s452_s25 }
  0x2c   :  { %v491_v24 = vunpack.c.l.bf16 %v537_v18  ;;  %570 = vmatprep.subr.bf16.mxu0 %v569_v7  ;;  %v492_v25 = vunpack.c.h.bf16 %v537_v18  ;;  %v495_v26 = vunpack.c.l.bf16 %v538_v19  ;;  %v496_v27 = vunpack.c.h.bf16 %v538_v19  ;;  %p627_p2 = scmp.ne.s32.totalorder %s452_s25, %s626_s26  ;;  %p632_p4 = scmp.lt.s32.totalorder %s626_s26, %s626_s26 }
  0x2d   :  { %v499_v28 = vunpack.c.l.bf16 %v539_v20  ;;  %v500_v29 = vunpack.c.h.bf16 %v539_v20  ;;  %v114_v30 = vsel %vm113_vm0, %v471_v8, 0.0  ;;  %v115_v31 = vsel %vm113_vm0, %v472_v9, 0.0 }
  0x2e   :  { %v123_v32 = vsel %vm113_vm0, %v475_v10, 0.0  ;;  %v116_v33 = vadd.f32 %v115_v31, %v114_v30  ;;  %v124_v34 = vsel %vm113_vm0, %v476_v14, 0.0  ;;  %v132_v35 = vsel %vm113_vm0, %v479_v15, 0.0  ;;  %p633_p5 = por %p632_p4, %p631_p3 }
  0x2f   :  { %v133_v36 = vsel %vm113_vm0, %v480_v16, 0.0  ;;  %572 = vmatpush3.bf16.msra.mxu0 %v569_v7  ;;  %v125_v37 = vadd.f32 %v124_v34, %v123_v32  ;;  %v141_v39 = vsel %vm113_vm0, %v483_v17, 0.0  ;;  %v142_v40 = vsel %vm113_vm0, %v484_v21, 0.0  ;;  %v541_v34 = vld [vmem:[#allocation2 + $0x48] sm:$0xff]  }
  0x30   :  { %v134_v38 = vadd.f32 %v133_v36, %v132_v35  ;;  %v117_v41 = vrot.slane %v116_v33, 4  ;;  %v143_v42 = vadd.f32 %v142_v40, %v141_v39  ;;  %v150_v43 = vsel %vm113_vm0, %v487_v22, 0.0  ;;  %v542_v39 = vld [vmem:[#allocation2 + $0x50] sm:$0xff]   ;;  %p634_p6 = pnand %p633_p5, %p627_p2 }
  0x31   :  { %v151_v44 = vsel %vm113_vm0, %v488_v23, 0.0  ;;  %v126_v45 = vrot.slane %v125_v37, 4  ;;  %v159_v48 = vsel %vm113_vm0, %v491_v24, 0.0  ;;  %v160_v51 = vsel %vm113_vm0, %v492_v25, 0.0  ;;  %v540_v25 = vld [vmem:[#allocation2 + $0x40] sm:$0xff]  }
  0x32   :  { %v135_v46 = vrot.slane %v134_v38, 4  ;;  %v152_v47 = vadd.f32 %v151_v44, %v150_v43  ;;  %v118_v49 = vadd.f32 %v117_v41, %v116_v33  ;;  %v144_v50 = vrot.slane %v143_v42, 4 }
  0x33   :  { %v168_v52 = vsel %vm113_vm0, %v495_v26, 0.0  ;;  %v127_v53 = vadd.f32 %v126_v45, %v125_v37  ;;  %v161_v56 = vadd.f32 %v160_v51, %v159_v48  ;;  %v169_v59 = vsel %vm113_vm0, %v496_v27, 0.0  ;;  %v543_v48 = vld [vmem:[#allocation2 + $0x58] sm:$0xff]  }
  0x34   :  { %v136_v54 = vadd.f32 %v135_v46, %v134_v38  ;;  %v153_v55 = vrot.slane %v152_v47, 4  ;;  %v119_v57 = vrot.slane %v118_v49, 2  ;;  %v145_v58 = vadd.f32 %v144_v50, %v143_v42 }
  0x35   :  { %v177_v60 = vsel %vm113_vm0, %v499_v28, 0.0  ;;  %v128_v61 = vrot.slane %v127_v53, 2  ;;  %v162_v0 = vrot.slane %v161_v56, 4  ;;  %v170_v3 = vadd.f32 %v169_v59, %v168_v52  ;;  %v546_v59 = vld [vmem:[#allocation2 + $0x70] sm:$0xff]  }
  0x36   :  { %v137_v62 = vrot.slane %v136_v54, 2  ;;  %v154_v63 = vadd.f32 %v153_v55, %v152_v47  ;;  %v120_v1 = vadd.f32 %v119_v57, %v118_v49  ;;  %v146_v2 = vrot.slane %v145_v58, 2  ;;  %v544_v49 = vld [vmem:[#allocation2 + $0x60] sm:$0xff]  }
  0x37   :  { %v178_v4 = vsel %vm113_vm0, %v500_v29, 0.0  ;;  %v129_v5 = vadd.f32 %v128_v61, %v127_v53  ;;  %v163_v8 = vadd.f32 %v162_v0, %v161_v56  ;;  %v171_v11 = vrot.slane %v170_v3, 4 }
  0x38   :  { %v138_v6 = vadd.f32 %v137_v62, %v136_v54  ;;  %v155_v7 = vrot.slane %v154_v63, 2  ;;  %v121_v9 = vrot.slane %v120_v1, 1  ;;  %v147_v10 = vadd.f32 %v146_v2, %v145_v58  ;;  %v545_v54 = vld [vmem:[#allocation2 + $0x68] sm:$0xff]  }
  0x39   :  { %v179_v12 = vadd.f32 %v178_v4, %v177_v60  ;;  %v130_v13 = vrot.slane %v129_v5, 1  ;;  %v164_v16 = vrot.slane %v163_v8, 2  ;;  %v172_v19 = vadd.f32 %v171_v11, %v170_v3  ;;  %v547_v60 = vld [vmem:[#allocation2 + $0x78] sm:$0xff]  }
  0x3a   :  { %v139_v14 = vrot.slane %v138_v6, 1  ;;  %v156_v15 = vadd.f32 %v155_v7, %v154_v63  ;;  %v122_v17 = vadd.f32 %v121_v9, %v120_v1  ;;  %v148_v18 = vrot.slane %v147_v10, 1 }
  0x3b   :  { %v180_v20 = vrot.slane %v179_v12, 4  ;;  %v131_v21 = vadd.f32 %v130_v13, %v129_v5  ;;  %v165_v24 = vadd.f32 %v164_v16, %v163_v8  ;;  %vm312_vm6 = vcmask 1046534  }
  0x3c   :  { %v140_v22 = vadd.f32 %v139_v14, %v138_v6  ;;  %v157_v23 = vrot.slane %v156_v15, 1  ;;  %v149_v26 = vadd.f32 %v148_v18, %v147_v10  ;;  %v173_v27 = vrot.slane %v172_v19, 2 }
  0x3d   :  { %v181_v28 = vadd.f32 %v180_v20, %v179_v12  ;;  %v259_v29 = vmul.f32 0.0625, %v122_v17  ;;  %v166_v31 = vrot.slane %v165_v24, 1  ;;  %v260_v32 = vmul.f32 0.0625, %v131_v21 }
  0x3e   :  { %v158_v30 = vadd.f32 %v157_v23, %v156_v15  ;;  %v261_v33 = vmul.f32 0.0625, %v140_v22  ;;  %vm314_vm7 = vcmask 1047559   ;;  %v174_v35 = vadd.f32 %v173_v27, %v172_v19 }
  0x3f   :  { %v182_v36 = vrot.slane %v181_v28, 2  ;;  %v262_v37 = vmul.f32 0.0625, %v149_v26  ;;  %v503_v38 = vunpack.c.l.bf16 %v540_v25  ;;  %v167_v40 = vadd.f32 %v166_v31, %v165_v24 }
  0x40   :  { %v263_v41 = vmul.f32 0.0625, %v158_v30  ;;  %v303_v42 = vsel %vm302_vm1, %v260_v32, %v259_v29  ;;  %v504_v43 = vunpack.c.h.bf16 %v540_v25  ;;  %v175_v44 = vrot.slane %v174_v35, 1 }
  0x41   :  { %v183_v45 = vadd.f32 %v182_v36, %v181_v28  ;;  %v305_v46 = vsel %vm304_vm2, %v261_v33, %v303_v42  ;;  %v507_v47 = vunpack.c.l.bf16 %v541_v34  ;;  %v264_v50 = vmul.f32 0.0625, %v167_v40 }
  0x42   :  { %v307_v51 = vsel %vm306_vm3, %v262_v37, %v305_v46  ;;  %v508_v52 = vunpack.c.h.bf16 %v541_v34  ;;  %v511_v53 = vunpack.c.l.bf16 %v542_v39  ;;  %v176_v55 = vadd.f32 %v175_v44, %v174_v35 }
  0x43   :  { %v184_v56 = vrot.slane %v183_v45, 1  ;;  %v309_v57 = vsel %vm308_vm4, %v263_v41, %v307_v51  ;;  %v512_v58 = vunpack.c.h.bf16 %v542_v39  ;;  %v515_v62 = vunpack.c.l.bf16 %v543_v48 }
  0x44   :  { %v311_v61 = vsel %vm310_vm5, %v264_v50, %v309_v57  ;;  %v516_v63 = vunpack.c.h.bf16 %v543_v48  ;;  %v519_v0 = vunpack.c.l.bf16 %v544_v49  ;;  %v265_v2 = vmul.f32 0.0625, %v176_v55 }
  0x45   :  { %v185_v1 = vadd.f32 %v184_v56, %v183_v45  ;;  %v520_v3 = vunpack.c.h.bf16 %v544_v49  ;;  %v523_v4 = vunpack.c.l.bf16 %v545_v54  ;;  %v524_v5 = vunpack.c.h.bf16 %v545_v54 }
  0x46   :  { %v527_v6 = vunpack.c.l.bf16 %v546_v59  ;;  %v528_v7 = vunpack.c.h.bf16 %v546_v59  ;;  %v531_v8 = vunpack.c.l.bf16 %v547_v60  ;;  %v313_v10 = vsel %vm312_vm6, %v265_v2, %v311_v61 }
  0x47   :  { %v266_v9 = vmul.f32 0.0625, %v185_v1  ;;  %v532_v11 = vunpack.c.h.bf16 %v547_v60  ;;  %v186_v12 = vsel %vm113_vm0, %v503_v38, 0.0  ;;  %v187_v13 = vsel %vm113_vm0, %v504_v43, 0.0 }
  0x48   :  { %v195_v14 = vsel %vm113_vm0, %v507_v47, 0.0  ;;  %v196_v15 = vsel %vm113_vm0, %v508_v52, 0.0  ;;  %v204_v16 = vsel %vm113_vm0, %v511_v53, 0.0  ;;  %v188_v18 = vadd.f32 %v187_v13, %v186_v12 }
  0x49   :  { %v315_v17 = vsel %vm314_vm7, %v266_v9, %v313_v10  ;;  %v197_v19 = vadd.f32 %v196_v15, %v195_v14  ;;  %v205_v20 = vsel %vm113_vm0, %v512_v58, 0.0  ;;  %v213_v22 = vsel %vm113_vm0, %v515_v62, 0.0 }
  0x4a   :  { %562 = vmatprep.mubr.msk.f32.mxu0 %vm113_vm0, %v315_v17  ;;  %v206_v21 = vadd.f32 %v205_v20, %v204_v16  ;;  %v214_v23 = vsel %vm113_vm0, %v516_v63, 0.0  ;;  %v222_v24 = vsel %vm113_vm0, %v519_v0, 0.0  ;;  %v189_v25 = vrot.slane %v188_v18, 4 }
  0x4b   :  { %v198_v26 = vrot.slane %v197_v19, 4  ;;  %v215_v27 = vadd.f32 %v214_v23, %v213_v22  ;;  %v223_v28 = vsel %vm113_vm0, %v520_v3, 0.0  ;;  %v231_v31 = vsel %vm113_vm0, %v523_v4, 0.0 }
  0x4c   :  { %v207_v29 = vrot.slane %v206_v21, 4  ;;  %v224_v30 = vadd.f32 %v223_v28, %v222_v24  ;;  %v232_v32 = vsel %vm113_vm0, %v524_v5, 0.0  ;;  %v190_v33 = vadd.f32 %v189_v25, %v188_v18 }
  0x4d   :  { %v199_v34 = vadd.f32 %v198_v26, %v197_v19  ;;  %v216_v35 = vrot.slane %v215_v27, 4  ;;  %v233_v36 = vadd.f32 %v232_v32, %v231_v31  ;;  %v240_v39 = vsel %vm113_vm0, %v527_v6, 0.0 }
  0x4e   :  { %v208_v37 = vadd.f32 %v207_v29, %v206_v21  ;;  %v225_v38 = vrot.slane %v224_v30, 4  ;;  %v241_v40 = vsel %vm113_vm0, %v528_v7, 0.0  ;;  %v191_v41 = vrot.slane %v190_v33, 2 }
  0x4f   :  { %v200_v42 = vrot.slane %v199_v34, 2  ;;  %v217_v43 = vadd.f32 %v216_v35, %v215_v27  ;;  %v234_v44 = vrot.slane %v233_v36, 4  ;;  %v242_v47 = vadd.f32 %v241_v40, %v240_v39 }
  0x50   :  { %v209_v45 = vrot.slane %v208_v37, 2  ;;  %v226_v46 = vadd.f32 %v225_v38, %v224_v30  ;;  %v249_v48 = vsel %vm113_vm0, %v531_v8, 0.0  ;;  %v192_v49 = vadd.f32 %v191_v41, %v190_v33 }
  0x51   :  { %v201_v50 = vadd.f32 %v200_v42, %v199_v34  ;;  %v218_v51 = vrot.slane %v217_v43, 2  ;;  %v235_v52 = vadd.f32 %v234_v44, %v233_v36  ;;  %v243_v55 = vrot.slane %v242_v47, 4  ;;  %v464_v36 = vld [vmem:[%s792_s2] ss:$0 sm:$0xff] }
  0x52   :  { %v210_v53 = vadd.f32 %v209_v45, %v208_v37  ;;  %v227_v54 = vrot.slane %v226_v46, 2  ;;  %v250_v56 = vsel %vm113_vm0, %v532_v11, 0.0  ;;  %v193_v57 = vrot.slane %v192_v49, 1 }
  0x53   :  { %v202_v58 = vrot.slane %v201_v50, 1  ;;  %v219_v59 = vadd.f32 %v218_v51, %v217_v43  ;;  %v236_v60 = vrot.slane %v235_v52, 2  ;;  %v244_v63 = vadd.f32 %v243_v55, %v242_v47 }
  0x54   :  { %v211_v61 = vrot.slane %v210_v53, 1  ;;  %v228_v62 = vadd.f32 %v227_v54, %v226_v46  ;;  %v251_v0 = vadd.f32 %v250_v56, %v249_v48  ;;  %v194_v1 = vadd.f32 %v193_v57, %v192_v49 }
  0x55   :  { %v203_v2 = vadd.f32 %v202_v58, %v201_v50  ;;  %v220_v3 = vrot.slane %v219_v59, 1  ;;  %v237_v4 = vadd.f32 %v236_v60, %v235_v52  ;;  %v245_v7 = vrot.slane %v244_v63, 2 }
  0x56   :  { %v212_v5 = vadd.f32 %v211_v61, %v210_v53  ;;  %v229_v6 = vrot.slane %v228_v62, 1  ;;  %v252_v8 = vrot.slane %v251_v0, 4  ;;  %v267_v12 = vmul.f32 0.0625, %v194_v1 }
  0x57   :  { %v221_v9 = vadd.f32 %v220_v3, %v219_v59  ;;  %v238_v10 = vrot.slane %v237_v4, 1  ;;  %v268_v11 = vmul.f32 0.0625, %v203_v2  ;;  %v246_v14 = vadd.f32 %v245_v7, %v244_v63  ;;  %v467_v63 = vld [vmem:[%s793_s3] ss:$0 sm:$0xff] }
  0x58   :  { %v230_v13 = vadd.f32 %v229_v6, %v228_v62  ;;  %v253_v15 = vadd.f32 %v252_v8, %v251_v0  ;;  %v269_v16 = vmul.f32 0.0625, %v212_v5  ;;  %v468_v2 = vld [vmem:[%s794_s4] ss:$0 sm:$0xff] }
  0x59   :  { %v239_v17 = vadd.f32 %v238_v10, %v237_v4  ;;  %v270_v18 = vmul.f32 0.0625, %v221_v9  ;;  %v316_v19 = vsel %vm302_vm1, %v268_v11, %v267_v12  ;;  %v247_v20 = vrot.slane %v246_v14, 1 }
  0x5a   :  { %v254_v21 = vrot.slane %v253_v15, 2  ;;  %v271_v22 = vmul.f32 0.0625, %v230_v13  ;;  %v317_v23 = vsel %vm304_vm2, %v269_v16, %v316_v19 }
  0x5b   :  { %v272_v24 = vmul.f32 0.0625, %v239_v17  ;;  %v318_v25 = vsel %vm306_vm3, %v270_v18, %v317_v23  ;;  %v248_v26 = vadd.f32 %v247_v20, %v246_v14 }
  0x5c   :  { %v255_v27 = vadd.f32 %v254_v21, %v253_v15  ;;  %v319_v28 = vsel %vm308_vm4, %v271_v22, %v318_v25 }
  0x5d   :  { %v273_v30 = vmul.f32 0.0625, %v248_v26  ;;  %v320_v31 = vsel %vm310_vm5, %v272_v24, %v319_v28 }
  0x5e   :  { %v256_v29 = vrot.slane %v255_v27, 1 }
  0x5f   :  { %v321_v33 = vsel %vm312_vm6, %v273_v30, %v320_v31 }
  0x60   :  { %v257_v32 = vadd.f32 %v256_v29, %v255_v27 }
  0x62   :  { %v274_v34 = vmul.f32 0.0625, %v257_v32 }
  0x64   :  { %v322_v35 = vsel %vm314_vm7, %v274_v34, %v321_v33 }
  0x65   :  { %563 = vmatmul.mubr.msk.f32.vlgmr.msra.gmra.mrb[0].mxu0 %vm113_vm0, %v322_v35 }
 0x138   :  { %v564_v37 = vpop.f32.mrb[0].mxu0 }
 0x139   :  { %v399_v38 = vadd.f32 %v564_v37, %v464_v36  ;;  %v393_v39 = vpop.f32.mrb[1].mxu0 }
 0x13a   :  { %v394_v40 = vadd.f32 %v464_v36, %v393_v39 }
 0x13c   :  { %v402_v41 = vadd.f32 %v399_v38, %v394_v40 }
 0x13e   :  { %v403_v42 = vrot.slane %v402_v41, 4 }
 0x140   :  { %v404_v43 = vadd.f32 %v403_v42, %v402_v41 }
 0x142   :  { %v405_v44 = vrot.slane %v404_v43, 2 }
 0x144   :  { %v406_v45 = vadd.f32 %v405_v44, %v404_v43 }
 0x146   :  { %v407_v46 = vrot.slane %v406_v45, 1 }
 0x148   :  { %v408_v47 = vadd.f32 %v407_v46, %v406_v45 }
 0x14a   :  { %v409_v48 = vmul.f32 0.0625, %v408_v47 }
 0x14c   :  { %v410_v49 = vsub.f32 %v394_v40, %v409_v48  ;;  %v411_v50 = vsub.f32 %v399_v38, %v409_v48 }
 0x14e   :  { %v412_v51 = vmul.f32 %v410_v49, %v410_v49  ;;  %v413_v52 = vmul.f32 %v411_v50, %v411_v50 }
 0x150   :  { %v414_v53 = vadd.f32 %v413_v52, %v412_v51 }
 0x152   :  { %v415_v54 = vrot.slane %v414_v53, 4 }
 0x154   :  { %v416_v55 = vadd.f32 %v415_v54, %v414_v53 }
 0x156   :  { %v417_v56 = vrot.slane %v416_v55, 2 }
 0x158   :  { %v418_v57 = vadd.f32 %v417_v56, %v416_v55 }
 0x15a   :  { %v419_v58 = vrot.slane %v418_v57, 1 }
 0x15c   :  { %v420_v59 = vadd.f32 %v419_v58, %v418_v57 }
 0x15e   :  { %v421_v60 = vmul.f32 0.0625, %v420_v59 }
 0x160   :  { %v422_v61 = vadd.f32 1e-05, %v421_v60 }
 0x162   :  { %580 = vrsqrt.f32 %v422_v61 }
 0x16c   :  { %v581_v62 = vpop.eup %580 }
 0x16d   :  { %v424_v0 = vmul.f32 %v581_v62, %v410_v49  ;;  %v425_v1 = vmul.f32 %v581_v62, %v411_v50 }
 0x16f   :  { %v433_v3 = vmul.f32 %v467_v63, %v424_v0  ;;  %v434_v4 = vmul.f32 %v467_v63, %v425_v1 }
 0x171   :  { %v442_v5 = vadd.f32 %v468_v2, %v433_v3  ;;  %v443_v6 = vadd.f32 %v468_v2, %v434_v4 }
 0x173   :  { %444 = vst [vmem:[#allocation7] sm:$0xff] %v442_v5  ;;  %445 = vst [vmem:[#allocation7 + $0x8] sm:$0xff] %v443_v6 }
 0x174   :  { %637 = shalt.err (!%p634_p6)
}
 0x175   :  { %s638_s4 = scalar_lea.hbm %s795_s5, 256 }
 0x176   :  { %p639_p7 = scmp.ne.s32.totalorder %s795_s5, %s638_s4  ;;  %p642_p8 = scmp.lt.u32.totalorder %s638_s4, %s795_s5 }
 0x178   :  { %p644_p9 = pnand %p642_p8, %p639_p7 }
 0x17a   :  { %647 = shalt.err (!%p644_p9)
}
 0x17b   :  { %457 = dma.vmem_to_hbm [thread:$0]  %s452_s25, 256, %s795_s5, [#allocation4], %s658_s0, %s658_s0, %s659_s17  }
 0x17c   :  { %652 = dma.done.wait [#allocation4], 256  }
 0x17d   :  { %653 = vsyncadd [#allocation4], 4294967040 }
 0x17e   :  { %461 = vsyncpa [#allocation3], 1 }
 0x17f   :  { %462 = vsyncpa [#allocation6], 1 }
 0x180   :  { %463 = vsyncpa [#allocation4], 1 }

</bundles_post_ra>
